<compile_context>
chip_gen: v6e
topology: v6e:2x2x1
jax: 0.10.0
libtpu: 0.0.40
codegen_flags: <defaults>
</compile_context>

<pallas_src>
import jax
import jax.numpy as jnp
from jax.experimental import pallas as pl
from jax.experimental.pallas import tpu as pltpu


def _conv7x7_bn_relu_kernel(w_ref, affine_ref, x_ref, o_ref):
    # (Cout, K) @ (K, tile_p) -> (Cout, tile_p): one lane-dense MXU contraction.
    y = jnp.dot(w_ref[...], x_ref[...], preferred_element_type=jnp.float32)
    aff = affine_ref[...]            # (Cout, 2): [:, 0] = BN scale, [:, 1] = BN shift
    scale = aff[:, 0:1]              # (Cout, 1) -> broadcast over lanes
    shift = aff[:, 1:2]
    o_ref[...] = jnp.maximum(y * scale + shift, 0.0)


def downsample7x7_forward(x_nchw, params, *, eps=1e-5, max_tile_p=2048):
    """Forward pass of downsample7x7 (eval-mode BN) via a fused Pallas GEMM."""
    N, Cin, H, W = x_nchw.shape
    w = params["w"]                              # (Cout, Cin, 7, 7)
    Cout, _, KH, KW = w.shape
    stride, pad = 2, 3
    Ho = (H + 2 * pad - KH) // stride + 1
    Wo = (W + 2 * pad - KW) // stride + 1

    x = x_nchw.astype(jnp.float32)
    xp = jnp.pad(x, ((0, 0), (0, 0), (pad, pad), (pad, pad)))

    # im2col: patches[c*KH*KW + kh*KW + kw, n*Ho*Wo + oh*Wo + ow]
    #       = xp[n, c, stride*oh + kh, stride*ow + kw]
    taps = []
    for kh in range(KH):
        for kw in range(KW):
            taps.append(
                xp[:, :, kh:kh + stride * Ho:stride, kw:kw + stride * Wo:stride])
    patches = jnp.stack(taps, axis=2)            # (N, Cin, KH*KW, Ho, Wo)
    patches = patches.transpose(1, 2, 0, 3, 4)   # (Cin, KH*KW, N, Ho, Wo)
    K = Cin * KH * KW
    P = N * Ho * Wo
    patches = patches.reshape(K, P)              # taps on sublanes, pixels on lanes

    # Pixel tile: multiple of 128 lanes, as large as reasonable (mem-bound op).
    tile_p = max(128, min(max_tile_p, ((P + 127) // 128) * 128))
    P_pad = pl.cdiv(P, tile_p) * tile_p
    if P_pad != P:
        patches = jnp.pad(patches, ((0, 0), (0, P_pad - P)))

    # bf16 matmul operands: MXU already uses bf16 passes for f32 at default
    # precision, so this only halves HBM traffic (accumulation stays f32).
    patches = patches.astype(jnp.bfloat16)
    w2d = w.reshape(Cout, K).astype(jnp.bfloat16)

    # Fold BN running stats into a per-channel affine (eval mode), kept in f32.
    scale = params["gamma"] / jnp.sqrt(params["var"] + eps)
    shift = params["beta"] - params["mean"] * scale
    affine = jnp.stack([scale, shift], axis=1).astype(jnp.float32)  # (Cout, 2)

    grid = (P_pad // tile_p,)
    cost = pl.CostEstimate(
        flops=2 * Cout * K * P_pad,
        transcendentals=0,
        bytes_accessed=(2 * K * P_pad          # bf16 patches
                        + 2 * Cout * K          # bf16 weights
                        + 4 * 2 * Cout          # f32 BN affine
                        + 4 * Cout * P_pad),    # f32 output
    )

    out = pl.pallas_call(
        _conv7x7_bn_relu_kernel,
        out_shape=jax.ShapeDtypeStruct((Cout, P_pad), jnp.float32),
        grid=grid,
        in_specs=[
            pl.BlockSpec((Cout, K), lambda i: (0, 0)),     # weights (resident)
            pl.BlockSpec((Cout, 2), lambda i: (0, 0)),     # packed BN affine
            pl.BlockSpec((K, tile_p), lambda i: (0, i)),   # patch tile (streamed)
        ],
        out_specs=pl.BlockSpec((Cout, tile_p), lambda i: (0, i)),
        compiler_params=pltpu.CompilerParams(
            dimension_semantics=("parallel",),
            vmem_limit_bytes=32 * 1024 * 1024,
        ),
        cost_estimate=cost,
    )(w2d, affine, patches)

    out = out[:, :P].reshape(Cout, N, Ho, Wo)
    return jnp.transpose(out, (1, 0, 2, 3))      # back to NCHW


def downsample7x7_reference(x_nchw, params, eps=1e-5):
    """Pure-JAX reference matching the PyTorch forward (BN in eval mode)."""
    w = params["w"].astype(jnp.float32)
    y = jax.lax.conv_general_dilated(
        x_nchw.astype(jnp.float32), w,
        window_strides=(2, 2), padding=((3, 3), (3, 3)),
        dimension_numbers=("NCHW", "OIHW", "NCHW"))
    scale = params["gamma"] / jnp.sqrt(params["var"] + eps)
    shift = params["beta"] - params["mean"] * scale
    y = y * scale[None, :, None, None] + shift[None, :, None, None]
    return jnp.maximum(y, 0.0)


def make_params(key, cin=16, cout=32):
    kw, kg, kb, km, kv = jax.random.split(key, 5)
    # Snap test weights to bf16-representable values so the bf16 MXU passes are
    # exact and the kernel/reference comparison is tight.
    snap = lambda a: a.astype(jnp.bfloat16).astype(jnp.float32)
    return {
        "w": snap(0.1 * jax.random.normal(kw, (cout, cin, 7, 7), jnp.float32)),
        "gamma": 1.0 + 0.1 * jax.random.normal(kg, (cout,), jnp.float32),
        "beta": 0.05 * jax.random.normal(kb, (cout,), jnp.float32),
        "mean": 0.1 * jax.random.normal(km, (cout,), jnp.float32),
        "var": 1.0 + 0.1 * jax.random.uniform(kv, (cout,), jnp.float32),
    }


if __name__ == "__main__":
    key = jax.random.PRNGKey(0)
    kx, kp = jax.random.split(key)

    # Module fixes Cin=16, Cout=32; small spatial / batch for the smoke test.
    N, Cin, H, W = 2, 16, 16, 16
    Cout = 32
    x = 0.5 * jax.random.normal(kx, (N, Cin, H, W), jnp.float32)
    x = x.astype(jnp.bfloat16).astype(jnp.float32)   # bf16-exact test activations
    params = make_params(kp, Cin, Cout)

    out = downsample7x7_forward(x, params)
    out = jax.block_until_ready(out)

    ref = downsample7x7_reference(x, params)
    assert out.shape == (N, Cout, H // 2, W // 2), out.shape
    max_err = float(jnp.max(jnp.abs(out - ref)))
    assert jnp.allclose(out, ref, rtol=1e-4, atol=1e-4), max_err

    print("KERNEL_OK")
</pallas_src>

<mosaic_0001>
module attributes {stable_mosaic.version = 11 : i64} {
  func.func @_conv7x7_bn_relu_kernel(%arg0: i32, %arg1: memref<32x784xbf16, #tpu.memory_space<vmem>>, %arg2: memref<32x2xf32, #tpu.memory_space<vmem>>, %arg3: memref<784x128xbf16, #tpu.memory_space<vmem>>, %arg4: memref<32x128xf32, #tpu.memory_space<vmem>>) attributes {dimension_semantics = [#tpu.dimension_semantics<parallel>], iteration_bounds = array<i64: 1>, scalar_prefetch = 0 : i64, scratch_operands = 0 : i64, tpu.core_type = #tpu.core_type<tc>, window_params = [{pipeline_mode = #tpu.pipeline_mode<synchronous>, transform_indices = @transform_0, window_bounds = array<i64: 32, 784>}, {pipeline_mode = #tpu.pipeline_mode<synchronous>, transform_indices = @transform_1, window_bounds = array<i64: 32, 2>}, {transform_indices = @transform_2, window_bounds = array<i64: 784, 128>}, {transform_indices = @transform_3, window_bounds = array<i64: 32, 128>}]} {
    %c0 = arith.constant 0 : index
    %c0_0 = arith.constant 0 : index
    %0 = vector.load %arg1[%c0, %c0_0] : memref<32x784xbf16, #tpu.memory_space<vmem>>, vector<32x784xbf16>
    %c0_1 = arith.constant 0 : index
    %c0_2 = arith.constant 0 : index
    %1 = vector.load %arg3[%c0_1, %c0_2] : memref<784x128xbf16, #tpu.memory_space<vmem>>, vector<784x128xbf16>
    %cst = arith.constant dense<0.000000e+00> : vector<32x128xf32>
    %2 = tpu.matmul %0, %1, %cst {dimension_numbers = #tpu.dot_dimension_numbers<[1], [0], [0], [1], [0, 0, 1, 1], [], []>} : vector<32x784xbf16>, vector<784x128xbf16>, vector<32x128xf32> -> vector<32x128xf32>
    %c0_3 = arith.constant 0 : index
    %c0_4 = arith.constant 0 : index
    %3 = vector.load %arg2[%c0_3, %c0_4] : memref<32x2xf32, #tpu.memory_space<vmem>>, vector<32x2xf32>
    %4 = vector.extract_strided_slice %3 {offsets = [0, 0], sizes = [32, 1], strides = [1, 1]} : vector<32x2xf32> to vector<32x1xf32>
    %5 = vector.extract_strided_slice %3 {offsets = [0, 1], sizes = [32, 1], strides = [1, 1]} : vector<32x2xf32> to vector<32x1xf32>
    %6 = vector.broadcast %4 : vector<32x1xf32> to vector<32x128xf32>
    %7 = arith.mulf %2, %6 : vector<32x128xf32>
    %8 = vector.broadcast %5 : vector<32x1xf32> to vector<32x128xf32>
    %9 = arith.addf %7, %8 : vector<32x128xf32>
    %cst_5 = arith.constant 0.000000e+00 : f32
    %10 = vector.broadcast %cst_5 : f32 to vector<32x128xf32>
    %11 = arith.maximumf %9, %10 : vector<32x128xf32>
    %c0_6 = arith.constant 0 : index
    %c0_7 = arith.constant 0 : index
    %12 = vector.load %arg4[%c0_6, %c0_7] : memref<32x128xf32, #tpu.memory_space<vmem>>, vector<32x128xf32>
    tpu.vector_store %arg4[%c0_6, %c0_7], %11 {strides = array<i32>} : memref<32x128xf32, #tpu.memory_space<vmem>>, vector<32x128xf32>,
    return
  }
  func.func @transform_0(%arg0: i32) -> (i32, i32) {
    %c0_i32 = arith.constant 0 : i32
    %c0_i32_0 = arith.constant 0 : i32
    %c0_i32_1 = arith.constant 0 : i32
    return %c0_i32, %c0_i32_0 : i32, i32
  }
  func.func @transform_1(%arg0: i32) -> (i32, i32) {
    %c0_i32 = arith.constant 0 : i32
    %c0_i32_0 = arith.constant 0 : i32
    %c0_i32_1 = arith.constant 0 : i32
    return %c0_i32, %c0_i32_0 : i32, i32
  }
  func.func @transform_2(%arg0: i32) -> (i32, i32) {
    %c0_i32 = arith.constant 0 : i32
    %c0_i32_0 = arith.constant 0 : i32
    return %c0_i32, %arg0 : i32, i32
  }
  func.func @transform_3(%arg0: i32) -> (i32, i32) {
    %c0_i32 = arith.constant 0 : i32
    %c0_i32_0 = arith.constant 0 : i32
    return %c0_i32, %arg0 : i32, i32
  }
}

</mosaic_0001>

<bundles_post_ra>
// kernel: tpu_custom_call.1
= control target key start
LH: loop header
LB: loop body
LE: loop exit
PB: predicated region body
PF: predicated region fallthrough
CT: control target
= control target key end

     0   :  { %8 = vsyncpa [#allocation3], 0  ;;  %s1159_s0 = inlined_call_operand.hbm [shape: bf16[32,784], index: 0, kind: input, shape index: {}]   ;;  %s1160_s1 = inlined_call_operand.vmem [shape: f32[32,2], index: 1, kind: input, shape index: {}]   ;;  %s1161_s2 = inlined_call_operand.hbm [shape: bf16[784,128], index: 2, kind: input, shape index: {}]   ;;  %s1162_s3 = inlined_call_operand.hbm [shape: f32[32,128], index: 3, kind: output, shape index: {}]  }
   0x1   :  { %9 = vsyncpa [#allocation6], 0 }
   0x2   :  { %10 = vsyncpa [#allocation4], 0  ;;  %s1107_s12 = smov [#allocation2]  }
   0x3   :  { %s16_s13 = sshll.u32 %s1107_s12, 4  ;;  %s17_s13 = int_to_ptr.vmem [resolvable:$true] %s16_s13 }
   0x4   :  { %s1049_s14 = scalar_lea.vmem %s17_s13, 1792  ;;  %p1054_p1 = scmp.lt.s32.totalorder %s17_s13, %s17_s13 }
   0x5   :  { %p1050_p0 = scmp.ne.s32.totalorder %s17_s13, %s1049_s14  ;;  %p1055_p2 = scmp.lt.s32.totalorder %s1049_s14, %s1049_s14 }
   0x7   :  { %p1056_p3 = por %p1055_p2, %p1054_p1 }
   0x9   :  { %p1057_p4 = pnand %p1056_p3, %p1050_p0 }
   0xb   :  { %1060 = shalt.err (!%p1057_p4)
}
   0xc   :  { %s1108_s15 = smov 448   ;;  %s1109_s16 = smov 28  }
   0xd   :  { %22 = dma.hbm_to_vmem [thread:$0]  %s1159_s0, 1792, %s17_s13, [#allocation3], %s1108_s15, %s1108_s15, %s1109_s16  }
   0xe   :  { %s1110_s19 = smov [#allocation5]  }
   0xf   :  { %s30_s20 = sshll.u32 %s1110_s19, 4  ;;  %s31_s20 = int_to_ptr.vmem [resolvable:$true] %s30_s20 }
  0x10   :  { %s1069_s21 = scalar_lea.vmem %s31_s20, 6272  ;;  %p1074_p6 = scmp.lt.s32.totalorder %s31_s20, %s31_s20 }
  0x11   :  { %p1070_p5 = scmp.ne.s32.totalorder %s31_s20, %s1069_s21  ;;  %p1075_p7 = scmp.lt.s32.totalorder %s1069_s21, %s1069_s21 }
  0x13   :  { %p1076_p8 = por %p1075_p7, %p1074_p6 }
  0x15   :  { %p1077_p9 = pnand %p1076_p8, %p1070_p5 }
  0x17   :  { %1080 = shalt.err (!%p1077_p9)
}
  0x18   :  { %s1111_s22 = smov 64   ;;  %s1112_s23 = smov 4  }
  0x19   :  { %36 = dma.hbm_to_vmem [thread:$0]  %s1161_s2, 6272, %s31_s20, [#allocation6], %s1111_s22, %s1111_s22, %s1112_s23  }
  0x1a   :  { %1101 = dma.done.wait [#allocation3], 1792  }
  0x1b   :  { %1102 = vsyncadd [#allocation3], 4294965504 }
  0x1c   :  { %1103 = dma.done.wait [#allocation6], 6272  }
  0x1d   :  { %1104 = vsyncadd [#allocation6], 4294961024  ;;  %v1113_v0 = vmov 0   ;;  %v972_v1 = vld [vmem:[#allocation5 + $0x78] sm:$0xff]   ;;  %v976_v5 = vld [vmem:[#allocation5 + $0x70] sm:$0xff]   ;;  %vm522_vm0 = vcmask 130048  }
  0x1e   :  { %968 = vset.pattern.permute.xlu0 %v1113_v0  ;;  %969 = vset.pattern.permute.xlu1 %v1113_v0  ;;  %v973_v2 = vld [vmem:[#allocation5 + $0xf8] sm:$0xff]   ;;  %v977_v6 = vld [vmem:[#allocation5 + $0xf0] sm:$0xff]   ;;  %v980_v9 = vld [vmem:[#allocation5 + $0x68] sm:$0xff]  }
  0x1f   :  { %864 = vmatprep.subr.bf16.mxu0 %v972_v1  ;;  %v974_v3 = vld [vmem:[#allocation5 + $0x38] sm:$0xff]   ;;  %892 = vmatprep.subr.bf16.mxu1 %v973_v2  ;;  %v978_v7 = vld [vmem:[#allocation5 + $0x30] sm:$0xff]   ;;  %v981_v10 = vld [vmem:[#allocation5 + $0xe8] sm:$0xff]  }
  0x20   :  { %v975_v4 = vld [vmem:[#allocation5 + $0xb8] sm:$0xff]   ;;  %865 = vmatpush3.bf16.msra.mxu0 %v974_v3  ;;  %v979_v8 = vld [vmem:[#allocation5 + $0xb0] sm:$0xff]   ;;  %v982_v11 = vld [vmem:[#allocation5 + $0x28] sm:$0xff]   ;;  %v1114_v3 = vmov 1  }
  0x21   :  { %893 = vmatpush3.bf16.msra.mxu1 %v975_v4  ;;  %866 = vmatprep.subr.bf16.mxu0 %v976_v5  ;;  %v983_v12 = vld [vmem:[#allocation5 + $0xa8] sm:$0xff]   ;;  %v984_v13 = vld [vmem:[#allocation5 + $0x60] sm:$0xff]   ;;  %v988_v17 = vld [vmem:[#allocation5 + $0x58] sm:$0xff]  }
  0x22   :  { %894 = vmatprep.subr.bf16.mxu1 %v977_v6  ;;  %v985_v14 = vld [vmem:[#allocation5 + $0xe0] sm:$0xff]   ;;  %v989_v18 = vld [vmem:[#allocation5 + $0xd8] sm:$0xff]   ;;  %v992_v21 = vld [vmem:[#allocation5 + $0x50] sm:$0xff]  }
  0x23   :  { %v986_v15 = vld [vmem:[#allocation5 + $0x20] sm:$0xff]   ;;  %v990_v19 = vld [vmem:[#allocation5 + $0x18] sm:$0xff]   ;;  %v993_v22 = vld [vmem:[#allocation5 + $0xd0] sm:$0xff]  }
  0x24   :  { %867 = vmatpush3.bf16.msra.mxu0 %v978_v7  ;;  %v987_v16 = vld [vmem:[#allocation5 + $0xa0] sm:$0xff]   ;;  %v991_v20 = vld [vmem:[#allocation5 + $0x98] sm:$0xff]   ;;  %v994_v23 = vld [vmem:[#allocation5 + $0x10] sm:$0xff]  }
  0x25   :  { %895 = vmatpush3.bf16.msra.mxu1 %v979_v8  ;;  %868 = vmatprep.subr.bf16.mxu0 %v980_v9  ;;  %v995_v24 = vld [vmem:[#allocation5 + $0x90] sm:$0xff]   ;;  %v996_v25 = vld [vmem:[#allocation5 + $0x48] sm:$0xff]   ;;  %v1000_v29 = vld [vmem:[#allocation5 + $0x40] sm:$0xff]  }
  0x26   :  { %896 = vmatprep.subr.bf16.mxu1 %v981_v10  ;;  %v997_v26 = vld [vmem:[#allocation5 + $0xc8] sm:$0xff]   ;;  %v1001_v30 = vld [vmem:[#allocation5 + $0xc0] sm:$0xff]   ;;  %v1006_v34 = vld [vmem:[#allocation2 + $0x4] ss:$28 sps:$4 sm:$0xff]  }
  0x27   :  { %v998_v27 = vld [vmem:[#allocation5 + $0x8] sm:$0xff]   ;;  %v1002_v31 = vld [vmem:[#allocation5] sm:$0xff]   ;;  %v1007_v35 = vld [vmem:[#allocation2 + $0x8] ss:$28 sps:$4 sm:$0xff]   ;;  %561 = vmatprep.mubr.bf16.mxu0 %v1006_v34 }
  0x28   :  { %869 = vmatpush3.bf16.msra.mxu0 %v982_v11  ;;  %v999_v28 = vld [vmem:[#allocation5 + $0x88] sm:$0xff]   ;;  %v1003_v32 = vld [vmem:[#allocation5 + $0x80] sm:$0xff]   ;;  %v1009_v36 = vld [vmem:[#allocation2 + $0xc] ss:$28 sps:$4 sm:$0xff]  }
  0x29   :  { %897 = vmatpush3.bf16.msra.mxu1 %v983_v12  ;;  %870 = vmatprep.subr.bf16.mxu0 %v984_v13  ;;  %v1004_v33 = vld [vmem:[#allocation2] ss:$28 sps:$4 sm:$0xff]   ;;  %v1010_v37 = vld [vmem:[#allocation5 + $0x178] sm:$0xff]   ;;  %v1016_v43 = vld [vmem:[#allocation5 + $0x160] sm:$0xff]  }
  0x2a   :  { %898 = vmatprep.subr.bf16.mxu1 %v985_v14  ;;  %610 = vmatprep.mubr.bf16.mxu1 %v1009_v36  ;;  %v1011_v38 = vld [vmem:[#allocation5 + $0x138] sm:$0xff]   ;;  %v1012_v39 = vld [vmem:[#allocation5 + $0x170] sm:$0xff]   ;;  %v1014_v41 = vld [vmem:[#allocation5 + $0x168] sm:$0xff]  }
  0x2b   :  { %v1013_v40 = vld [vmem:[#allocation5 + $0x130] sm:$0xff]   ;;  %v1015_v42 = vld [vmem:[#allocation5 + $0x128] sm:$0xff]   ;;  %v1017_v44 = vld [vmem:[#allocation5 + $0x120] sm:$0xff]  }
  0x2c   :  { %871 = vmatpush3.bf16.msra.mxu0 %v986_v15  ;;  %v1019_v45 = vld [vmem:[#allocation2 + $0x3c] ss:$28 sps:$4 sm:$0xff]   ;;  %v1021_v46 = vld [vmem:[#allocation2 + $0x44] ss:$28 sps:$4 sm:$0xff]   ;;  %v1018_v47 = vld [vmem:[#allocation5 + $0x158] sm:$0xff]  }
  0x2d   :  { %899 = vmatpush3.bf16.msra.mxu1 %v987_v16  ;;  %872 = vmatprep.subr.bf16.mxu0 %v988_v17  ;;  %v1024_v48 = vld [vmem:[#allocation2 + $0x38] ss:$28 sps:$4 sm:$0xff]   ;;  %v1025_v49 = vld [vmem:[#allocation2 + $0x40] ss:$28 sps:$4 sm:$0xff]   ;;  %v1023_v50 = vld [vmem:[#allocation5 + $0x118] sm:$0xff]  }
  0x2e   :  { %900 = vmatprep.subr.bf16.mxu1 %v989_v18  ;;  %v1026_v51 = vld [vmem:[#allocation5 + $0x150] sm:$0xff]   ;;  %v1030_v52 = vld [vmem:[#allocation5 + $0x180] sm:$0xff]   ;;  %v1028_v54 = vld [vmem:[#allocation5 + $0x148] sm:$0xff]  }
  0x2f   :  { %v1027_v53 = vld [vmem:[#allocation5 + $0x110] sm:$0xff]   ;;  %v1035_v55 = vld [vmem:[#allocation2 + $0x14] ss:$28 sps:$4 sm:$0xff]   ;;  %v1029_v58 = vld [vmem:[#allocation5 + $0x108] sm:$0xff]  }
  0x30   :  { %873 = vmatpush3.bf16.msra.mxu0 %v990_v19  ;;  %v1036_v56 = vld [vmem:[#allocation2 + $0x18] ss:$28 sps:$4 sm:$0xff]   ;;  %v1037_v57 = vld [vmem:[#allocation2 + $0x50] ss:$28 sps:$4 sm:$0xff]   ;;  %v725_v60 = vld [vmem:[%s1160_s1] sm:$0xff] }
  0x31   :  { %901 = vmatpush3.bf16.msra.mxu1 %v991_v20  ;;  %874 = vmatprep.subr.bf16.mxu0 %v992_v21  ;;  %v1031_v59 = vld [vmem:[#allocation5 + $0x140] sm:$0xff]   ;;  %v726_v62 = vld [vmem:[%s1160_s1 + $0x8] sm:$0xff]  ;;  %v728_v63 = vld [vmem:[%s1160_s1 + $0x18] sm:$0xff] }
  0x32   :  { %902 = vmatprep.subr.bf16.mxu1 %v993_v22  ;;  %v727_v61 = vld [vmem:[%s1160_s1 + $0x10] sm:$0xff]  ;;  %731 = vperm.xlu0 %968, %v725_v60   ;;  %v1038_v2 = vld [vmem:[#allocation2 + $0x4c] ss:$28 sps:$4 sm:$0xff]   ;;  %s1115_s1 = smov [#allocation7]  }
  0x33   :  { %741 = vperm.xlu1 %969, %v727_v61   ;;  %v1032_v0 = vld [vmem:[#allocation5 + $0x100] sm:$0xff]   ;;  %v1040_v4 = vld [vmem:[#allocation2 + $0x48] ss:$28 sps:$4 sm:$0xff]   ;;  %s786_s5 = sshll.u32 %s1115_s1, 4  ;;  %s787_s5 = int_to_ptr.vmem [resolvable:$true] %s786_s5 }
  0x34   :  { %875 = vmatpush3.bf16.msra.mxu0 %v994_v23  ;;  %v1033_v1 = vld [vmem:[#allocation2 + $0x10] ss:$28 sps:$4 sm:$0xff]   ;;  %s1081_s6 = scalar_lea.vmem %s787_s5, 512  ;;  %p1086_p11 = scmp.lt.s32.totalorder %s787_s5, %s787_s5 }
  0x35   :  { %903 = vmatpush3.bf16.msra.mxu1 %v995_v24  ;;  %876 = vmatprep.subr.bf16.mxu0 %v996_v25  ;;  %p1082_p10 = scmp.ne.s32.totalorder %s787_s5, %s1081_s6  ;;  %p1087_p12 = scmp.lt.s32.totalorder %s1081_s6, %s1081_s6 }
  0x36   :  { %904 = vmatprep.subr.bf16.mxu1 %v997_v26  ;;  %736 = vperm.xlu0 %968, %v726_v62  }
  0x37   :  { %746 = vperm.xlu1 %969, %v728_v63   ;;  %p1088_p13 = por %p1087_p12, %p1086_p11 }
  0x38   :  { %877 = vmatpush3.bf16.msra.mxu0 %v998_v27 }
  0x39   :  { %905 = vmatpush3.bf16.msra.mxu1 %v999_v28  ;;  %878 = vmatprep.subr.bf16.mxu0 %v1000_v29  ;;  %p1089_p0 = pnand %p1088_p13, %p1082_p10 }
  0x3a   :  { %906 = vmatprep.subr.bf16.mxu1 %v1001_v30  ;;  %970 = vset.pattern.permute.xlu0 %v1114_v3 }
  0x3b   :  { %971 = vset.pattern.permute.xlu1 %v1114_v3  ;;  %754 = vperm.xlu0 %970, %v725_v60  }
  0x3c   :  { %879 = vmatpush3.bf16.msra.mxu0 %v1002_v31  ;;  %758 = vperm.xlu1 %971, %v726_v62  }
  0x3d   :  { %907 = vmatpush3.bf16.msra.mxu1 %v1003_v32  ;;  %920 = vmatprep.subr.bf16.mxu0 %v1010_v37 }
  0x3e   :  { %951 = vmatprep.subr.bf16.mxu1 %v1030_v52 }
  0x3f   :  { %562 = vmatmul.mubr.bf16.vlgmr.msra.gmra.mxu0 %v1004_v33  ;;  %766 = vperm.xlu0 %970, %v728_v63  }
  0x40   :  { %611 = vmatmul.mubr.bf16.vlgmr.msra.gmra.mxu1 %v1007_v35  ;;  %921 = vmatpush3.bf16.msra.mxu0 %v1011_v38 }
  0x41   :  { %922 = vmatprep.subr.bf16.mxu0 %v1012_v39  ;;  %569 = vmatprep.mubr.bf16.mxu0 %v1019_v45 }
  0x42   :  { %618 = vmatprep.mubr.bf16.mxu1 %v1021_v46  ;;  %952 = vmatpush3.bf16.msra.mxu1 %v1030_v52 }
  0x43   :  { %762 = vperm.xlu1 %971, %v727_v61  }
  0x44   :  { %923 = vmatpush3.bf16.msra.mxu0 %v1013_v40 }
  0x45   :  { %924 = vmatprep.subr.bf16.mxu0 %v1014_v41 }
  0x47   :  { %570 = vmatmul.mubr.bf16.gmra.mxu0 %v1024_v48 }
  0x48   :  { %925 = vmatpush3.bf16.msra.mxu0 %v1015_v42  ;;  %619 = vmatmul.mubr.bf16.gmra.mxu1 %v1025_v49 }
  0x49   :  { %926 = vmatprep.subr.bf16.mxu0 %v1016_v43  ;;  %659 = vmatprep.mubr.bf16.mxu0 %v1035_v55 }
  0x4a   :  { %953 = vmatprep.mubr.msk.bf16.mxu1 %vm522_vm0, %v1036_v56 }
  0x4c   :  { %927 = vmatpush3.bf16.msra.mxu0 %v1017_v44 }
  0x4d   :  { %928 = vmatprep.subr.bf16.mxu0 %v1018_v47 }
  0x50   :  { %929 = vmatpush3.bf16.msra.mxu0 %v1023_v50  ;;  %954 = vmatmul.mubr.msk.bf16.vlgmr.msra.gmra.mxu1 %vm522_vm0, %v1037_v57 }
  0x51   :  { %930 = vmatprep.subr.bf16.mxu0 %v1026_v51 }
  0x54   :  { %931 = vmatpush3.bf16.msra.mxu0 %v1027_v53 }
  0x55   :  { %932 = vmatprep.subr.bf16.mxu0 %v1028_v54 }
  0x58   :  { %933 = vmatpush3.bf16.msra.mxu0 %v1029_v58 }
  0x59   :  { %934 = vmatprep.subr.bf16.mxu0 %v1031_v59 }
  0x5c   :  { %935 = vmatpush3.bf16.msra.mxu0 %v1032_v0 }
  0x5f   :  { %660 = vmatmul.mubr.bf16.vlgmr.msra.gmra.mxu0 %v1033_v1 }
  0x60   :  { %667 = vmatprep.mubr.bf16.mxu0 %v1038_v2 }
  0x67   :  { %668 = vmatmul.mubr.bf16.gmra.mxu0 %v1040_v4 }
  0xad   :  { %v732_v20 = vpop.permute.xlu0 %731 }
  0xae   :  { %v742_v22 = vpop.permute.xlu1 %741 }
  0xb1   :  { %v737_v28 = vpop.permute.xlu0 %736 }
  0xb2   :  { %v747_v34 = vpop.permute.xlu1 %746 }
  0xb6   :  { %v755_v44 = vpop.permute.xlu0 %754 }
  0xb7   :  { %v759_v52 = vpop.permute.xlu1 %758 }
  0xbe   :  { %v763_v2 = vpop.permute.xlu1 %762 }
  0xff   :  { %v880_v6 = vpop.f32.mrf.mxu0 }
 0x100   :  { %v908_v5 = vpop.f32.mrf.mxu1 }
 0x101   :  { %v881_v8 = vpop.f32.mrf.mxu0 }
 0x102   :  { %v909_v7 = vpop.f32.mrf.mxu1  ;;  %v882_v24 = vadd.f32 %v881_v8, %v880_v6 }
 0x103   :  { %v883_v10 = vpop.f32.mrf.mxu0  ;;  %v910_v25 = vadd.f32 %v909_v7, %v908_v5 }
 0x104   :  { %v911_v9 = vpop.f32.mrf.mxu1 }
 0x105   :  { %v884_v13 = vpop.f32.mrf.mxu0  ;;  %v613_v30 = vadd.f32 %v910_v25, %v882_v24 }
 0x106   :  { %v912_v11 = vpop.f32.mrf.mxu1  ;;  %v885_v31 = vadd.f32 %v884_v13, %v883_v10  ;;  %v767_v10 = vpop.permute.xlu0 %766 }
 0x107   :  { %v886_v14 = vpop.f32.mrf.mxu0  ;;  %v913_v32 = vadd.f32 %v912_v11, %v911_v9 }
 0x108   :  { %v914_v12 = vpop.f32.mrf.mxu1 }
 0x109   :  { %v887_v16 = vpop.f32.mrf.mxu0  ;;  %v616_v41 = vadd.f32 %v913_v32, %v885_v31 }
 0x10a   :  { %v915_v15 = vpop.f32.mrf.mxu1  ;;  %v888_v38 = vadd.f32 %v887_v16, %v886_v14 }
 0x10b   :  { %v889_v18 = vpop.f32.mrf.mxu0  ;;  %v916_v39 = vadd.f32 %v915_v15, %v914_v12 }
 0x10c   :  { %v917_v17 = vpop.f32.mrf.mxu1 }
 0x10d   :  { %v890_v23 = vpop.f32.mrf.mxu0  ;;  %v621_v49 = vadd.f32 %v916_v39, %v888_v38 }
 0x10e   :  { %v918_v19 = vpop.f32.mrf.mxu1  ;;  %v891_v50 = vadd.f32 %v890_v23, %v889_v18 }
 0x10f   :  { %v919_v53 = vadd.f32 %v918_v19, %v917_v17 }
 0x110   :  { %v955_v21 = vpop.f32.mrf.mxu1 }
 0x111   :  { %v624_v62 = vadd.f32 %v919_v53, %v891_v50 }
 0x112   :  { %v710_v27 = vpop.f32.mrf.mxu1 }
 0x114   :  { %v956_v36 = vpop.f32.mrf.mxu1 }
 0x116   :  { %v713_v46 = vpop.f32.mrf.mxu1 }
 0x11f   :  { %v936_v26 = vpop.f32.mrf.mxu0 }
 0x121   :  { %v937_v29 = vpop.f32.mrf.mxu0 }
 0x122   :  { %v938_v33 = vadd.f32 %v937_v29, %v936_v26 }
 0x123   :  { %v939_v35 = vpop.f32.mrf.mxu0 }
 0x124   :  { %v662_v37 = vadd.f32 %v938_v33, %v613_v30 }
 0x125   :  { %v940_v40 = vpop.f32.mrf.mxu0 }
 0x126   :  { %v941_v42 = vadd.f32 %v940_v40, %v939_v35  ;;  %v711_v43 = vadd.f32 %v710_v27, %v662_v37 }
 0x127   :  { %v942_v45 = vpop.f32.mrf.mxu0 }
 0x128   :  { %v749_v47 = vmul.f32 %v732_v20, %v711_v43  ;;  %v665_v48 = vadd.f32 %v941_v42, %v616_v41 }
 0x129   :  { %v943_v51 = vpop.f32.mrf.mxu0 }
 0x12a   :  { %v769_v54 = vadd.f32 %v755_v44, %v749_v47  ;;  %v944_v55 = vadd.f32 %v943_v51, %v942_v45  ;;  %v714_v56 = vadd.f32 %v713_v46, %v665_v48 }
 0x12b   :  { %v945_v57 = vpop.f32.mrf.mxu0 }
 0x12c   :  { %v773_v58 = vmax.f32 %v769_v54, 0.0  ;;  %v670_v59 = vadd.f32 %v944_v55, %v621_v49  ;;  %v750_v60 = vmul.f32 %v737_v28, %v714_v56 }
 0x12d   :  { %v946_v61 = vpop.f32.mrf.mxu0 }
 0x12e   :  { %777 = vst [vmem:[#allocation7] sm:$0xff] %v773_v58  ;;  %v770_v63 = vadd.f32 %v759_v52, %v750_v60  ;;  %v947_v0 = vadd.f32 %v946_v61, %v945_v57  ;;  %v719_v1 = vadd.f32 %v955_v21, %v670_v59 }
 0x130   :  { %v774_v3 = vmax.f32 %v770_v63, 0.0  ;;  %v673_v4 = vadd.f32 %v947_v0, %v624_v62  ;;  %v751_v5 = vmul.f32 %v742_v22, %v719_v1 }
 0x132   :  { %778 = vst [vmem:[#allocation7 + $0x8] sm:$0xff] %v774_v3  ;;  %v771_v6 = vadd.f32 %v763_v2, %v751_v5  ;;  %v722_v7 = vadd.f32 %v956_v36, %v673_v4 }
 0x134   :  { %v775_v8 = vmax.f32 %v771_v6, 0.0  ;;  %v752_v9 = vmul.f32 %v747_v34, %v722_v7 }
 0x136   :  { %779 = vst [vmem:[#allocation7 + $0x10] sm:$0xff] %v775_v8  ;;  %v772_v11 = vadd.f32 %v767_v10, %v752_v9 }
 0x138   :  { %v776_v12 = vmax.f32 %v772_v11, 0.0 }
 0x13a   :  { %780 = vst [vmem:[#allocation7 + $0x18] sm:$0xff] %v776_v12 }
 0x13b   :  { %1092 = shalt.err (!%p1089_p0)
}
 0x13c   :  { %s1116_s7 = smov 128   ;;  %s1117_s8 = smov 8  }
 0x13d   :  { %792 = dma.vmem_to_hbm [thread:$0]  %s787_s5, 512, %s1162_s3, [#allocation4], %s1116_s7, %s1116_s7, %s1117_s8  }
 0x13e   :  { %1105 = dma.done.wait [#allocation4], 512  }
 0x13f   :  { %1106 = vsyncadd [#allocation4], 4294966784 }
 0x140   :  { %796 = vsyncpa [#allocation3], 1 }
 0x141   :  { %797 = vsyncpa [#allocation6], 1 }
 0x142   :  { %798 = vsyncpa [#allocation4], 1 }

</bundles_post_ra>
